<compile_context>
chip_gen: v7x
topology: tpu7x:2x2x1
jax: 0.10.0
libtpu: 0.0.40
codegen_flags: <defaults>
</compile_context>

<pallas_src>
from functools import partial

import jax
import jax.numpy as jnp
from jax.experimental import pallas as pl
from jax.experimental.pallas import tpu as pltpu


def bow_kernel(ids_ref, len_ref, m_ref, b_ref, out_ref):
    # ids_ref : (BT, S)     int32   token ids for this batch tile
    # len_ref : (BT, 1)     float32 per-example sequence lengths
    # m_ref   : (V, C_PAD)  float32 fused operand M = table @ W4^T (zero-padded)
    # b_ref   : (1, C_PAD)  float32 linear4 bias (zero-padded)
    # out_ref : (BT, C_PAD) float32
    ids = ids_ref[...]
    bt, seq = ids.shape
    v = m_ref.shape[0]

    # Bag-of-words counts WITHOUT materializing a (BT, S, V) one-hot:
    #   counts[b, t] = #{ s : ids[b, s] == t }
    # Unrolled loop over the small static sequence axis; vocab iota hoisted.
    vocab_iota = jax.lax.broadcasted_iota(jnp.int32, (bt, v), 1)
    counts = jnp.zeros((bt, v), dtype=jnp.int32)
    for s in range(seq):                               # static trip count (S=8)
        counts = counts + (ids[:, s:s + 1] == vocab_iota).astype(jnp.int32)
    counts_f = counts.astype(jnp.float32)              # single cast on (BT, V)

    # Single MXU matmul: sum_s table[ids[b,s]] @ W^T == counts @ (table @ W^T).
    proj = jnp.dot(counts_f, m_ref[...], preferred_element_type=jnp.float32)

    # Divide by length after the projection (algebraically identical, done on
    # the small (BT, C_PAD) tensor).  Exact reciprocal to preserve 1e-4 tol.
    inv_len = pl.reciprocal(len_ref[...], approx=False)
    out_ref[...] = proj * inv_len + b_ref[...]


def _invariant_spec(block_shape):
    """BlockSpec for a grid-invariant operand: constant index_map and
    single-buffered (no point double-buffering a block that never changes)."""
    idx = lambda i: (0, 0)
    try:
        return pl.BlockSpec(block_shape, idx, pipeline_mode=pl.Buffered(1))
    except Exception:  # older API without pipeline_mode: fall back gracefully
        return pl.BlockSpec(block_shape, idx)


def _vmem_capacity_bytes():
    try:
        return int(pltpu.get_tpu_info().vmem_capacity_bytes)
    except Exception:
        return 64 << 20  # v7x per-TC worst case


def _pick_batch_tile(batch, seq, vocab, c_pad):
    """VMEM-budget-aware batch tile.  Tiny batches use one full-array block;
    large batches get a multiple-of-8 tile sized to the VMEM budget, capped so
    the grid has >= 2 steps (v7x megacore sharding of the 'parallel' axis)."""
    if batch < 16:
        return batch  # full-array block (block dims == array dims), grid=(1,)
    budget = _vmem_capacity_bytes() // 2            # headroom for scratch/spills
    params_bytes = 4 * (vocab * c_pad + c_pad)      # single-buffered M + bias
    per_row = 4 * (seq + 1 + c_pad + vocab)         # ids + len + out + counts
    avail = max(budget - params_bytes - (1 << 20), 16 * per_row)
    bt_cap = max(8, avail // (2 * per_row))         # 2x: double-buffered tiles
    bt_cap = min(int(bt_cap), batch // 2)           # >= 2 grid steps when possible
    divisors = [d for d in range(8, max(bt_cap, 8) + 1, 8) if batch % d == 0]
    return divisors[-1] if divisors else batch


def prepare_params(embedding_table, w4, b4):
    """One-time parameter prep, hoisted out of the per-forward call path.

    Fuses the embedding table with linear4's weight (no nonlinearity between
    them) and zero-pads the class dim to a lane-dense multiple of 128.
    """
    table = embedding_table.astype(jnp.float32)          # (V, E)
    w_t = jnp.transpose(w4).astype(jnp.float32)          # (E, C)
    m = table @ w_t                                      # (V, C) fused operand
    v, c = m.shape
    c_pad = max(128, -(-c // 128) * 128)
    m_pad = jnp.zeros((v, c_pad), jnp.float32).at[:, :c].set(m)
    b_pad = jnp.zeros((1, c_pad), jnp.float32).at[0, :c].set(
        b4.astype(jnp.float32))
    return m_pad, b_pad


@partial(jax.jit, static_argnames=("num_classes",))
def bow_forward(train_x, train_x_len, m_pad, b_pad, num_classes):
    """
    train_x     : (B, S) int token ids
    train_x_len : (B,)   int/float lengths
    m_pad       : (V, C_PAD) float32 fused table @ linear4.weight^T (padded)
    b_pad       : (1, C_PAD) float32 linear4 bias (padded)
    returns     : (B, num_classes) float32
    """
    B, S = train_x.shape
    V, C_pad = m_pad.shape

    # NOTE: ids block is (bt, S) int32; at production S consider a lane-dense
    # layout for the id loads (minor win, skipped at this size).
    ids = train_x.astype(jnp.int32)
    lens = train_x_len.astype(jnp.float32).reshape(B, 1)

    bt = _pick_batch_tile(B, S, V, C_pad)
    grid = (B // bt,)

    vmem_cap = _vmem_capacity_bytes()
    vmem_limit = int(min(vmem_cap * 3 // 4, 128 << 20))

    out_pad = pl.pallas_call(
        bow_kernel,
        out_shape=jax.ShapeDtypeStruct((B, C_pad), jnp.float32),
        grid_spec=pltpu.PrefetchScalarGridSpec(
            num_scalar_prefetch=0,
            grid=grid,
            in_specs=[
                pl.BlockSpec((bt, S), lambda i: (i, 0)),   # token ids (tiled)
                pl.BlockSpec((bt, 1), lambda i: (i, 0)),   # lengths   (tiled)
                _invariant_spec((V, C_pad)),               # fused table@W^T
                _invariant_spec((1, C_pad)),               # bias
            ],
            out_specs=pl.BlockSpec((bt, C_pad), lambda i: (i, 0)),
        ),
        compiler_params=pltpu.CompilerParams(
            dimension_semantics=("parallel",),
            vmem_limit_bytes=vmem_limit,
        ),
    )(ids, lens, m_pad, b_pad)

    return out_pad[:, :num_classes]


if __name__ == "__main__":
    # Small config consistent with the module:
    #   vocab=64, embed_size=32, seq=8, batch=4, num_classes=4
    V, E, S, B, C = 64, 32, 8, 4, 4

    key = jax.random.PRNGKey(0)
    k_emb, k_w, k_b, k_x, k_len = jax.random.split(key, 5)

    # Deterministic "pretrained" embedding table and linear4 params.
    embedding_table = jax.random.normal(k_emb, (V, E), dtype=jnp.float32)
    w4 = jax.random.normal(k_w, (C, E), dtype=jnp.float32) * (1.0 / jnp.sqrt(E))
    b4 = jax.random.normal(k_b, (C,), dtype=jnp.float32) * 0.01

    # Inputs: token ids (assumed in [0, V)) and per-example lengths.
    train_x = jax.random.randint(k_x, (B, S), 0, V, dtype=jnp.int32)
    train_x_len = jax.random.randint(k_len, (B,), 1, S + 1, dtype=jnp.int32)

    # One-time parameter prep (fusion + padding), hoisted out of the call path.
    m_pad, b_pad = prepare_params(embedding_table, w4, b4)

    out = bow_forward(train_x, train_x_len, m_pad, b_pad, num_classes=C)
    out = jax.block_until_ready(out)

    # Pure-JAX reference (same semantics as the PyTorch forward).
    ref_embeds = jnp.take(embedding_table, train_x, axis=0).astype(jnp.float32)
    ref_avg = jnp.sum(ref_embeds, axis=1) / train_x_len.astype(jnp.float32)[:, None]
    ref_out = ref_avg @ w4.T + b4

    assert out.shape == (B, C)
    assert jnp.allclose(out, ref_out, atol=1e-4, rtol=1e-4), (
        float(jnp.max(jnp.abs(out - ref_out))))

    print("KERNEL_OK")
</pallas_src>

<mosaic_0001>
module attributes {stable_mosaic.version = 11 : i64} {
  func.func @bow_kernel(%arg0: i32, %arg1: memref<4x8xi32, #tpu.memory_space<vmem>>, %arg2: memref<4x1xf32, #tpu.memory_space<vmem>>, %arg3: memref<64x128xf32, #tpu.memory_space<vmem>>, %arg4: memref<1x128xf32, #tpu.memory_space<vmem>>, %arg5: memref<4x128xf32, #tpu.memory_space<vmem>>) attributes {dimension_semantics = [#tpu.dimension_semantics<parallel>], iteration_bounds = array<i64: 1>, scalar_prefetch = 0 : i64, scratch_operands = 0 : i64, tpu.core_type = #tpu.core_type<tc>, window_params = [{transform_indices = @transform_0, window_bounds = array<i64: 4, 8>}, {transform_indices = @transform_1, window_bounds = array<i64: 4, 1>}, {pipeline_mode = #tpu.pipeline_mode<synchronous>, transform_indices = @transform_2, window_bounds = array<i64: 64, 128>}, {pipeline_mode = #tpu.pipeline_mode<synchronous>, transform_indices = @transform_3, window_bounds = array<i64: 1, 128>}, {transform_indices = @transform_4, window_bounds = array<i64: 4, 128>}]} {
    %c0 = arith.constant 0 : index
    %c0_0 = arith.constant 0 : index
    %0 = vector.load %arg1[%c0, %c0_0] : memref<4x8xi32, #tpu.memory_space<vmem>>, vector<4x8xi32>
    %1 = tpu.iota {dimensions = array<i32: 1>} : vector<4x64xi32>
    %c0_i32 = arith.constant 0 : i32
    %2 = vector.broadcast %c0_i32 : i32 to vector<4x64xi32>
    %3 = vector.extract_strided_slice %0 {offsets = [0, 0], sizes = [4, 1], strides = [1, 1]} : vector<4x8xi32> to vector<4x1xi32>
    %4 = vector.broadcast %3 : vector<4x1xi32> to vector<4x64xi32>
    %5 = arith.cmpi eq, %4, %1 : vector<4x64xi32>
    %6 = arith.extui %5 : vector<4x64xi1> to vector<4x64xi32>
    %7 = arith.addi %2, %6 : vector<4x64xi32>
    %8 = vector.extract_strided_slice %0 {offsets = [0, 1], sizes = [4, 1], strides = [1, 1]} : vector<4x8xi32> to vector<4x1xi32>
    %9 = vector.broadcast %8 : vector<4x1xi32> to vector<4x64xi32>
    %10 = arith.cmpi eq, %9, %1 : vector<4x64xi32>
    %11 = arith.extui %10 : vector<4x64xi1> to vector<4x64xi32>
    %12 = arith.addi %7, %11 : vector<4x64xi32>
    %13 = vector.extract_strided_slice %0 {offsets = [0, 2], sizes = [4, 1], strides = [1, 1]} : vector<4x8xi32> to vector<4x1xi32>
    %14 = vector.broadcast %13 : vector<4x1xi32> to vector<4x64xi32>
    %15 = arith.cmpi eq, %14, %1 : vector<4x64xi32>
    %16 = arith.extui %15 : vector<4x64xi1> to vector<4x64xi32>
    %17 = arith.addi %12, %16 : vector<4x64xi32>
    %18 = vector.extract_strided_slice %0 {offsets = [0, 3], sizes = [4, 1], strides = [1, 1]} : vector<4x8xi32> to vector<4x1xi32>
    %19 = vector.broadcast %18 : vector<4x1xi32> to vector<4x64xi32>
    %20 = arith.cmpi eq, %19, %1 : vector<4x64xi32>
    %21 = arith.extui %20 : vector<4x64xi1> to vector<4x64xi32>
    %22 = arith.addi %17, %21 : vector<4x64xi32>
    %23 = vector.extract_strided_slice %0 {offsets = [0, 4], sizes = [4, 1], strides = [1, 1]} : vector<4x8xi32> to vector<4x1xi32>
    %24 = vector.broadcast %23 : vector<4x1xi32> to vector<4x64xi32>
    %25 = arith.cmpi eq, %24, %1 : vector<4x64xi32>
    %26 = arith.extui %25 : vector<4x64xi1> to vector<4x64xi32>
    %27 = arith.addi %22, %26 : vector<4x64xi32>
    %28 = vector.extract_strided_slice %0 {offsets = [0, 5], sizes = [4, 1], strides = [1, 1]} : vector<4x8xi32> to vector<4x1xi32>
    %29 = vector.broadcast %28 : vector<4x1xi32> to vector<4x64xi32>
    %30 = arith.cmpi eq, %29, %1 : vector<4x64xi32>
    %31 = arith.extui %30 : vector<4x64xi1> to vector<4x64xi32>
    %32 = arith.addi %27, %31 : vector<4x64xi32>
    %33 = vector.extract_strided_slice %0 {offsets = [0, 6], sizes = [4, 1], strides = [1, 1]} : vector<4x8xi32> to vector<4x1xi32>
    %34 = vector.broadcast %33 : vector<4x1xi32> to vector<4x64xi32>
    %35 = arith.cmpi eq, %34, %1 : vector<4x64xi32>
    %36 = arith.extui %35 : vector<4x64xi1> to vector<4x64xi32>
    %37 = arith.addi %32, %36 : vector<4x64xi32>
    %38 = vector.extract_strided_slice %0 {offsets = [0, 7], sizes = [4, 1], strides = [1, 1]} : vector<4x8xi32> to vector<4x1xi32>
    %39 = vector.broadcast %38 : vector<4x1xi32> to vector<4x64xi32>
    %40 = arith.cmpi eq, %39, %1 : vector<4x64xi32>
    %41 = arith.extui %40 : vector<4x64xi1> to vector<4x64xi32>
    %42 = arith.addi %37, %41 : vector<4x64xi32>
    %43 = arith.sitofp %42 : vector<4x64xi32> to vector<4x64xf32>
    %c0_1 = arith.constant 0 : index
    %c0_2 = arith.constant 0 : index
    %44 = vector.load %arg3[%c0_1, %c0_2] : memref<64x128xf32, #tpu.memory_space<vmem>>, vector<64x128xf32>
    %cst = arith.constant dense<0.000000e+00> : vector<4x128xf32>
    %45 = tpu.matmul %43, %44, %cst {dimension_numbers = #tpu.dot_dimension_numbers<[1], [0], [0], [1], [0, 0, 1, 1], [], []>} : vector<4x64xf32>, vector<64x128xf32>, vector<4x128xf32> -> vector<4x128xf32>
    %c0_3 = arith.constant 0 : index
    %c0_4 = arith.constant 0 : index
    %46 = vector.load %arg2[%c0_3, %c0_4] : memref<4x1xf32, #tpu.memory_space<vmem>>, vector<4x1xf32>
    %47 = tpu.reciprocal %46 : vector<4x1xf32> -> vector<4x1xf32>
    %48 = vector.broadcast %47 : vector<4x1xf32> to vector<4x128xf32>
    %49 = arith.mulf %45, %48 : vector<4x128xf32>
    %c0_5 = arith.constant 0 : index
    %c0_6 = arith.constant 0 : index
    %50 = vector.load %arg4[%c0_5, %c0_6] : memref<1x128xf32, #tpu.memory_space<vmem>>, vector<1x128xf32>
    %51 = vector.broadcast %50 : vector<1x128xf32> to vector<4x128xf32>
    %52 = arith.addf %49, %51 : vector<4x128xf32>
    %c0_7 = arith.constant 0 : index
    %c0_8 = arith.constant 0 : index
    %53 = vector.load %arg5[%c0_7, %c0_8] : memref<4x128xf32, #tpu.memory_space<vmem>>, vector<4x128xf32>
    tpu.vector_store %arg5[%c0_7, %c0_8], %52 {strides = array<i32>} : memref<4x128xf32, #tpu.memory_space<vmem>>, vector<4x128xf32>,
    return
  }
  func.func @transform_0(%arg0: i32) -> (i32, i32) {
    %c0_i32 = arith.constant 0 : i32
    %c0_i32_0 = arith.constant 0 : i32
    return %arg0, %c0_i32 : i32, i32
  }
  func.func @transform_1(%arg0: i32) -> (i32, i32) {
    %c0_i32 = arith.constant 0 : i32
    %c0_i32_0 = arith.constant 0 : i32
    return %arg0, %c0_i32 : i32, i32
  }
  func.func @transform_2(%arg0: i32) -> (i32, i32) {
    %c0_i32 = arith.constant 0 : i32
    %c0_i32_0 = arith.constant 0 : i32
    %c0_i32_1 = arith.constant 0 : i32
    return %c0_i32, %c0_i32_0 : i32, i32
  }
  func.func @transform_3(%arg0: i32) -> (i32, i32) {
    %c0_i32 = arith.constant 0 : i32
    %c0_i32_0 = arith.constant 0 : i32
    %c0_i32_1 = arith.constant 0 : i32
    return %c0_i32, %c0_i32_0 : i32, i32
  }
  func.func @transform_4(%arg0: i32) -> (i32, i32) {
    %c0_i32 = arith.constant 0 : i32
    %c0_i32_0 = arith.constant 0 : i32
    return %arg0, %c0_i32 : i32, i32
  }
}

</mosaic_0001>

<bundles_post_ra>
// kernel: bow_forward.1
= control target key start
LH: loop header
LB: loop body
LE: loop exit
PB: predicated region body
PF: predicated region fallthrough
CT: control target
= control target key end

     0   :  { %9 = vsyncpa [#allocation3], 0  ;;  %s396_s0 = inlined_call_operand.vmem [shape: s32[4,8], index: 0, kind: input, shape index: {}]   ;;  %s397_s1 = inlined_call_operand.vmem [shape: f32[4,1], index: 1, kind: input, shape index: {}]   ;;  %s398_s2 = inlined_call_operand.hbm [shape: f32[64,128], index: 2, kind: input, shape index: {}]   ;;  %s399_s3 = inlined_call_operand.vmem [shape: f32[1,128], index: 3, kind: input, shape index: {}]   ;;  %s400_s4 = inlined_call_operand.hbm [shape: f32[4,128], index: 4, kind: output, shape index: {}]  }
   0x1   :  { %10 = vsyncpa [#allocation4], 0  ;;  %s313_s15 = smov [#allocation2]   ;;  %s265_s19 = scalar_lea.hbm %s398_s2, 1024 }
   0x2   :  { %s20_s16 = sshll.u32 %s313_s15, 4  ;;  %p266_p0 = scmp.ne.s32.totalorder %s398_s2, %s265_s19  ;;  %s21_s16 = int_to_ptr.vmem [resolvable:$true] %s20_s16 }
   0x3   :  { %p269_p1 = scmp.lt.u32.totalorder %s265_s19, %s398_s2 }
   0x5   :  { %p271_p2 = pnand %p269_p1, %p266_p0 }
   0x7   :  { %274 = shalt.err (!%p271_p2)
}
   0x8   :  { %s275_s24 = scalar_lea.vmem %s21_s16, 1024  ;;  %p280_p4 = scmp.lt.s32.totalorder %s21_s16, %s21_s16 }
   0x9   :  { %p276_p3 = scmp.ne.s32.totalorder %s21_s16, %s275_s24  ;;  %p281_p5 = scmp.lt.s32.totalorder %s275_s24, %s275_s24 }
   0xb   :  { %p282_p6 = por %p281_p5, %p280_p4 }
   0xd   :  { %p283_p7 = pnand %p282_p6, %p276_p3 }
   0xf   :  { %286 = shalt.err (!%p283_p7)
}
  0x10   :  { %s314_s25 = smov 128   ;;  %s315_s26 = smov 8  }
  0x11   :  { %26 = dma.hbm_to_vmem [thread:$0]  %s398_s2, 1024, %s21_s16, [#allocation3], %s314_s25, %s314_s25, %s315_s26  }
  0x12   :  { %309 = dma.done.wait [#allocation3], 1024  }
  0x13   :  { %310 = vsyncadd [#allocation3], 4294966272  ;;  %v316_v0 = vmov 2   ;;  %v317_v1 = vmov 0   ;;  %v32_v2 = vld [vmem:[%s396_s0] sm:$0xf]  ;;  %v33_v25 = vlaneseq }
  0x14   :  { %256 = vset.pattern.permute.xlu1 %v316_v0  ;;  %254 = vset.pattern.permute.xlu0 %v317_v1  ;;  %v318_v3 = vmov 3   ;;  %v319_v4 = vmov 1   ;;  %v83_v5 = vld [vmem:[#allocation2] sm:$0xff]  ;;  %v84_v6 = vld [vmem:[#allocation2 + $0x8] sm:$0xff]  ;;  %v320_v7 = vmov 4   ;;  %v321_v8 = vmov 5  }
  0x15   :  { %47 = vperm.xlu1 %256, %v32_v2   ;;  %36 = vperm.xlu0 %254, %v32_v2   ;;  %v228_v9 = vpack.c.bf16 %v84_v6, %v83_v5  ;;  %v322_v10 = vmov 0.0|0.0   ;;  %v85_v11 = vld [vmem:[#allocation2 + $0x10] sm:$0xff]  ;;  %v86_v12 = vld [vmem:[#allocation2 + $0x18] sm:$0xff]  ;;  %v323_v14 = vmov 6   ;;  %v87_v15 = vld [vmem:[#allocation2 + $0x20] sm:$0xff]  ;;  %v324_v18 = vmov 7  }
  0x16   :  { %227 = vmatprep.subr.bf16.mxu0 %v322_v10  ;;  %v231_v13 = vpack.c.bf16 %v86_v12, %v85_v11  ;;  %v88_v16 = vld [vmem:[#allocation2 + $0x28] sm:$0xff]  ;;  %v89_v19 = vld [vmem:[#allocation2 + $0x30] sm:$0xff]  ;;  %v90_v20 = vld [vmem:[#allocation2 + $0x38] sm:$0xff]  ;;  %vm325_vm0 = vmmov 0   ;;  %v326_v22 = vmov 0.0   ;;  %v34_v28 = vand.u32 127, %v33_v25 }
  0x17   :  { %229 = vmatpush3.bf16.msra.mxu0 %v228_v9  ;;  %v234_v17 = vpack.c.bf16 %v88_v16, %v87_v15  ;;  %v237_v21 = vpack.c.bf16 %v90_v20, %v89_v19  ;;  %224 = vmatprep.mubr.msk.f32.mxu0 %vm325_vm0, %v326_v22  ;;  %v165_v23 = vld [vmem:[%s397_s1] sm:$0xf]  ;;  %vm91_vm9 = vcmask 523264   ;;  %s327_s6 = smov [#allocation5]  }
  0x18   :  { %230 = vmatprep.subr.bf16.mxu0 %v322_v10  ;;  %263 = vrcp.f32 %v165_v23  ;;  %v198_v53 = vld [vmem:[%s399_s3] ss:$0 sm:$0xff]  ;;  %s188_s7 = sshll.u32 %s327_s6, 4  ;;  %s189_s7 = int_to_ptr.vmem [resolvable:$true] %s188_s7 }
  0x19   :  { %257 = vset.pattern.permute.xlu1 %v318_v3  ;;  %255 = vset.pattern.permute.xlu0 %v319_v4  ;;  %s287_s8 = scalar_lea.vmem %s189_s7, 64  ;;  %p292_p9 = scmp.lt.s32.totalorder %s189_s7, %s189_s7 }
  0x1a   :  { %53 = vperm.xlu1 %257, %v32_v2   ;;  %41 = vperm.xlu0 %255, %v32_v2   ;;  %p288_p8 = scmp.ne.s32.totalorder %s189_s7, %s287_s8  ;;  %p293_p10 = scmp.lt.s32.totalorder %s287_s8, %s287_s8 }
  0x1b   :  { %232 = vmatpush3.bf16.msra.mxu0 %v231_v13 }
  0x1c   :  { %233 = vmatprep.subr.bf16.mxu0 %v322_v10  ;;  %p294_p11 = por %p293_p10, %p292_p9 }
  0x1e   :  { %258 = vset.pattern.permute.xlu1 %v320_v7  ;;  %259 = vset.pattern.permute.xlu0 %v321_v8  ;;  %p295_p12 = pnand %p294_p11, %p288_p8 }
  0x1f   :  { %59 = vperm.xlu1 %258, %v32_v2   ;;  %65 = vperm.xlu0 %259, %v32_v2  }
  0x20   :  { %235 = vmatpush3.bf16.msra.mxu0 %v234_v17 }
  0x21   :  { %236 = vmatprep.subr.bf16.mxu0 %v322_v10 }
  0x22   :  { %v264_v24 = vpop.eup %263 }
  0x23   :  { %260 = vset.pattern.permute.xlu1 %v323_v14  ;;  %262 = vset.pattern.permute.xlu0 %v317_v1 }
  0x24   :  { %71 = vperm.xlu1 %260, %v32_v2   ;;  %238 = vmatpush3.bf16.msra.mxu0 %v237_v21 }
  0x25   :  { %169 = vperm.xlu0 %262, %v264_v24  }
  0x28   :  { %261 = vset.pattern.permute.xlu1 %v324_v18 }
  0x29   :  { %77 = vperm.xlu1 %261, %v32_v2  }
  0x94   :  { %v48_v26 = vpop.permute.xlu1 %47  ;;  %v37_v27 = vpop.permute.xlu0 %36 }
  0x95   :  { %vm38_vm1 = vcmp.eq.s32.totalorder %v37_v27, %v34_v28  ;;  %vm49_vm2 = vcmp.eq.s32.totalorder %v48_v26, %v34_v28 }
  0x96   :  { %v39_v31 = vsel %vm38_vm1, 1, %v317_v1  ;;  %v50_v34 = vsel %vm49_vm2, 1, %v317_v1 }
  0x99   :  { %v54_v29 = vpop.permute.xlu1 %53  ;;  %v42_v30 = vpop.permute.xlu0 %41 }
  0x9a   :  { %vm43_vm3 = vcmp.eq.s32.totalorder %v42_v30, %v34_v28  ;;  %vm55_vm4 = vcmp.eq.s32.totalorder %v54_v29, %v34_v28 }
  0x9b   :  { %v44_v32 = vsel %vm43_vm3, 1, %v317_v1  ;;  %v56_v38 = vsel %vm55_vm4, 1, %v317_v1 }
  0x9c   :  { %v45_v33 = vadd.s32 %v44_v32, %v39_v31 }
  0x9e   :  { %v51_v35 = vadd.s32 %v50_v34, %v45_v33  ;;  %v60_v36 = vpop.permute.xlu1 %59  ;;  %v66_v37 = vpop.permute.xlu0 %65 }
  0x9f   :  { %vm61_vm5 = vcmp.eq.s32.totalorder %v60_v36, %v34_v28  ;;  %vm67_vm6 = vcmp.eq.s32.totalorder %v66_v37, %v34_v28 }
  0xa0   :  { %v57_v39 = vadd.s32 %v56_v38, %v51_v35  ;;  %v62_v40 = vsel %vm61_vm5, 1, %v317_v1  ;;  %v68_v42 = vsel %vm67_vm6, 1, %v317_v1 }
  0xa2   :  { %v63_v41 = vadd.s32 %v62_v40, %v57_v39 }
  0xa3   :  { %v72_v43 = vpop.permute.xlu1 %71 }
  0xa4   :  { %vm73_vm7 = vcmp.eq.s32.totalorder %v72_v43, %v34_v28  ;;  %v69_v44 = vadd.s32 %v68_v42, %v63_v41  ;;  %v170_v51 = vpop.permute.xlu0 %169 }
  0xa5   :  { %v74_v45 = vsel %vm73_vm7, 1, %v317_v1 }
  0xa6   :  { %v75_v47 = vadd.s32 %v74_v45, %v69_v44 }
  0xa8   :  { %v78_v46 = vpop.permute.xlu1 %77 }
  0xa9   :  { %vm79_vm8 = vcmp.eq.s32.totalorder %v78_v46, %v34_v28 }
  0xaa   :  { %v80_v48 = vsel %vm79_vm8, 1, %v317_v1 }
  0xab   :  { %v81_v49 = vadd.s32 %v80_v48, %v75_v47 }
  0xad   :  { %v82_v50 = vcvt.s32.f32 %v81_v49 }
  0xaf   :  { %225 = vmatmul.mubr.msk.f32.vlgmr.msra.gmra.mrb[0].mxu0 %vm91_vm9, %v82_v50 }
 0x182   :  { %v161_v52 = vpop.f32.mrb[0].mxu0 }
 0x183   :  { %v172_v54 = vmul.f32 %v170_v51, %v161_v52  ;;  %v226_v55 = vpop.f32.mrb[1].mxu0 }
 0x185   :  { %v180_v56 = vadd.f32 %v198_v53, %v172_v54 }
 0x187   :  { %181 = vst [vmem:[#allocation5] sm:$0xf] %v180_v56 }
 0x188   :  { %298 = shalt.err (!%p295_p12)
}
 0x189   :  { %s299_s11 = scalar_lea.hbm %s400_s4, 64 }
 0x18a   :  { %p300_p13 = scmp.ne.s32.totalorder %s400_s4, %s299_s11  ;;  %p303_p0 = scmp.lt.u32.totalorder %s299_s11, %s400_s4 }
 0x18c   :  { %p305_p1 = pnand %p303_p0, %p300_p13 }
 0x18e   :  { %308 = shalt.err (!%p305_p1)
}
 0x18f   :  { %191 = dma.vmem_to_hbm [thread:$0]  %s189_s7, 64, %s400_s4, [#allocation4]  }
 0x190   :  { %311 = dma.done.wait [#allocation4], 64  }
 0x191   :  { %312 = vsyncadd [#allocation4], 4294967232 }
 0x192   :  { %195 = vsyncpa [#allocation3], 1 }
 0x193   :  { %196 = vsyncpa [#allocation4], 1 }

</bundles_post_ra>
